<compile_context>
chip_gen: v7x
topology: tpu7x:2x2x1
jax: 0.10.0
libtpu: 0.0.40
codegen_flags: <defaults>
</compile_context>

<pallas_src>
import functools
import math

import jax
import jax.numpy as jnp
from jax.experimental import pallas as pl
from jax.experimental.pallas import tpu as pltpu


# ----------------------------------------------------------------------------
# Buffer setup — mirrors the torch __init__ math exactly.
# ----------------------------------------------------------------------------
def make_positional_encoding(d_model: int, max_seq_length: int = 100) -> jnp.ndarray:
    position = jnp.arange(0, max_seq_length, dtype=jnp.float32)[:, None]          # (L, 1)
    div_term = jnp.exp(
        jnp.arange(0, d_model, 2, dtype=jnp.float32) * (-math.log(10000.0) / d_model)
    )                                                                              # (D//2,)
    angles = position * div_term                                                   # (L, D//2)
    pe = jnp.zeros((max_seq_length, d_model), dtype=jnp.float32)
    pe = pe.at[:, 0::2].set(jnp.sin(angles))
    pe = pe.at[:, 1::2].set(jnp.cos(angles))
    return pe                                                                      # (L, D)


# ----------------------------------------------------------------------------
# Kernels
# ----------------------------------------------------------------------------
def _pe_add_kernel(x_ref, pe_ref, o_ref):
    """Eval mode: out = x + pe (dropout is identity). Pure VPU add."""
    # x_ref: (TB, TN); pe_ref: (1, TN) broadcasts over the row tile.
    o_ref[...] = (x_ref[...] + pe_ref[...]).astype(o_ref.dtype)


def _pe_add_dropout_prng_kernel(x_ref, pe_ref, seed_ref, o_ref, *, threshold: int,
                                scale: float):
    """Training mode (compiled TPU path): in-kernel hardware PRNG dropout.

    keep <=> bits >= threshold, threshold = round(p * 2^32); kept values are
    scaled by 1/(1-p).  Integer-threshold compare only — no int->float cast.
    """
    # Independent stream per grid block (and hence per TensorCore on v7x).
    block_id = pl.program_id(0) * pl.num_programs(1) + pl.program_id(1)
    pltpu.prng_seed(seed_ref[0], block_id)
    raw = pltpu.prng_random_bits(x_ref.shape)
    bits = raw if raw.dtype == jnp.uint32 else pltpu.bitcast(raw, jnp.uint32)
    y = x_ref[...] + pe_ref[...]
    keep = bits >= jnp.uint32(threshold)
    o_ref[...] = jnp.where(keep, y * jnp.asarray(scale, y.dtype),
                           jnp.zeros_like(y)).astype(o_ref.dtype)


def _pe_add_dropout_bits_kernel(x_ref, pe_ref, bits_ref, o_ref, *, threshold: int,
                                scale: float):
    """Training mode fallback (non-TPU / interpret): mask bits streamed in as uint16."""
    y = x_ref[...] + pe_ref[...]
    keep = bits_ref[...] >= jnp.uint16(threshold)
    o_ref[...] = jnp.where(keep, y * jnp.asarray(scale, y.dtype),
                           jnp.zeros_like(y)).astype(o_ref.dtype)


# ----------------------------------------------------------------------------
# Tiling helpers
# ----------------------------------------------------------------------------
_TILE_BYTES = 4 << 20          # ~4 MiB per x / out tile (mem-bound: big blocks)
_LANE_TILE_MAX = 32768         # cap on flattened lane-chunk width (elements)
_VMEM_LIMIT_BYTES = 32 * 1024 * 1024   # explicit scoped-VMEM budget (fits v5e/v6e/v7x)


def _sublane_align(dtype) -> int:
    """Row alignment matching sublane packing: 8 for f32, 16 for bf16, 32 for 8-bit."""
    return max(8, 32 // jnp.dtype(dtype).itemsize)


def _pick_tile(n: int, align: int, max_tile: int) -> int:
    """Largest tile <= max_tile that is a multiple of `align` and divides n,
    or n itself if n already fits."""
    if n <= max_tile:
        return n
    t = (max_tile // align) * align
    while t >= align:
        if n % t == 0:
            return t
        t -= align
    return max(align, (max_tile // align) * align)   # non-dividing fallback (grid uses cdiv)


# ----------------------------------------------------------------------------
# Wrapper
# ----------------------------------------------------------------------------
def positional_encoding_forward(x, pe, *, dropout_p: float = 0.1,
                                training: bool = False, rng_key=None):
    """x: (B, S, D); pe: (max_seq_length, D). Returns (B, S, D)."""
    B, S, D = x.shape
    SD = S * D
    on_tpu = jax.default_backend() == "tpu"

    # Layout plumbing only: flatten (S, D) so the kernel's last dim is
    # lane-dense (a large multiple of 128) instead of D -> clean full vst.
    x2 = x.reshape(B, SD)
    pe2 = pe[:S, :].reshape(1, SD).astype(x.dtype)

    itemsize = jnp.dtype(x.dtype).itemsize
    row_align = _sublane_align(x.dtype)
    tn = _pick_tile(SD, 128, _LANE_TILE_MAX)
    rows_budget = max(row_align, _TILE_BYTES // max(1, tn * itemsize))
    tb = _pick_tile(B, row_align, rows_budget)
    grid = (pl.cdiv(B, tb), pl.cdiv(SD, tn))

    x_spec = pl.BlockSpec((tb, tn), lambda i, j: (i, j))
    pe_spec = pl.BlockSpec((1, tn), lambda i, j: (0, j))   # resident when one lane chunk
    out_spec = pl.BlockSpec((tb, tn), lambda i, j: (i, j))
    out_shape = jax.ShapeDtypeStruct((B, SD), x.dtype)
    cparams = pltpu.CompilerParams(
        dimension_semantics=("parallel", "parallel"),
        vmem_limit_bytes=_VMEM_LIMIT_BYTES)
    io_aliases = {0: 0} if on_tpu else {}   # donate x2's HBM buffer to the output

    use_dropout = training and dropout_p > 0.0
    if use_dropout and dropout_p >= 1.0:
        # torch.nn.Dropout(p=1.0) zeroes everything; early-out avoids 1/(1-p).
        return jnp.zeros_like(x)

    if not use_dropout:
        cost = pl.CostEstimate(flops=B * SD, transcendentals=0,
                               bytes_accessed=(2 * B * SD + SD) * itemsize)
        out = pl.pallas_call(
            _pe_add_kernel,
            out_shape=out_shape,
            grid_spec=pltpu.PrefetchScalarGridSpec(
                num_scalar_prefetch=0, grid=grid,
                in_specs=[x_spec, pe_spec], out_specs=out_spec),
            compiler_params=cparams,
            cost_estimate=cost,
            input_output_aliases=io_aliases,
        )(x2, pe2)
        return out.reshape(B, S, D)

    scale = 1.0 / (1.0 - dropout_p)
    if rng_key is None:
        rng_key = jax.random.PRNGKey(0)

    if on_tpu:
        # Compiled TPU path: mask generated in-kernel with the hardware PRNG.
        threshold = min(int(round(dropout_p * float(1 << 32))), (1 << 32) - 1)
        seed = jax.random.randint(rng_key, (1,), minval=0,
                                  maxval=jnp.iinfo(jnp.int32).max, dtype=jnp.int32)
        seed_spec = pl.BlockSpec(memory_space=pltpu.MemorySpace.SMEM)
        cost = pl.CostEstimate(flops=3 * B * SD, transcendentals=0,
                               bytes_accessed=(2 * B * SD + SD) * itemsize)
        out = pl.pallas_call(
            functools.partial(_pe_add_dropout_prng_kernel,
                              threshold=threshold, scale=scale),
            out_shape=out_shape,
            grid_spec=pltpu.PrefetchScalarGridSpec(
                num_scalar_prefetch=0, grid=grid,
                in_specs=[x_spec, pe_spec, seed_spec], out_specs=out_spec),
            compiler_params=cparams,
            cost_estimate=cost,
            input_output_aliases=io_aliases,
        )(x2, pe2, seed)
        return out.reshape(B, S, D)

    # Fallback (interpret / non-TPU backend): TPU PRNG primitives may not lower
    # there, so stream a 16-bit mask from the wrapper (half the old uint32 traffic).
    threshold16 = min(int(round(dropout_p * float(1 << 16))), (1 << 16) - 1)
    bits = jax.random.bits(rng_key, (B, SD), dtype=jnp.uint16)
    cost = pl.CostEstimate(flops=3 * B * SD, transcendentals=0,
                           bytes_accessed=(2 * B * SD + SD) * itemsize + B * SD * 2)
    out = pl.pallas_call(
        functools.partial(_pe_add_dropout_bits_kernel,
                          threshold=threshold16, scale=scale),
        out_shape=out_shape,
        grid_spec=pltpu.PrefetchScalarGridSpec(
            num_scalar_prefetch=0, grid=grid,
            in_specs=[x_spec, pe_spec, x_spec], out_specs=out_spec),
        compiler_params=cparams,
        cost_estimate=cost,
        input_output_aliases=io_aliases,
    )(x2, pe2, bits)
    return out.reshape(B, S, D)


# ----------------------------------------------------------------------------
# Main
# ----------------------------------------------------------------------------
if __name__ == "__main__":
    B, S, D = 2, 8, 32
    MAX_LEN = 100
    DROPOUT_P = 0.1

    key = jax.random.PRNGKey(0)
    kx, kdrop = jax.random.split(key)
    x = jax.random.normal(kx, (B, S, D), dtype=jnp.float32)
    pe = make_positional_encoding(D, MAX_LEN)

    # Eval-mode forward (dropout == identity): exact semantics check.
    out_eval = jax.block_until_ready(
        positional_encoding_forward(x, pe, dropout_p=DROPOUT_P, training=False))
    ref_eval = x + pe[None, :S, :]
    assert out_eval.shape == (B, S, D) and out_eval.dtype == jnp.float32
    assert jnp.allclose(out_eval, ref_eval, atol=1e-6, rtol=1e-6)

    # Training-mode forward: structural check (works for both the in-kernel
    # PRNG path and the fallback bits path) — every element must be either
    # dropped (0) or (x + pe) / (1 - p), and the keep rate must be ~1 - p.
    out_train = jax.block_until_ready(
        positional_encoding_forward(x, pe, dropout_p=DROPOUT_P, training=True,
                                    rng_key=kdrop))
    assert out_train.shape == (B, S, D)
    scale = 1.0 / (1.0 - DROPOUT_P)
    scaled_ref = ref_eval * scale
    is_kept = jnp.abs(out_train - scaled_ref) <= 1e-5 * (1.0 + jnp.abs(scaled_ref))
    is_dropped = jnp.abs(out_train) <= 1e-6
    assert bool(jnp.all(is_kept | is_dropped))
    keep_rate = float(jnp.mean(is_kept.astype(jnp.float32)))
    assert 0.75 <= keep_rate <= 0.99, f"unexpected keep rate {keep_rate}"

    print("KERNEL_OK")
</pallas_src>

<mosaic_0001>
module attributes {stable_mosaic.version = 11 : i64} {
  func.func @_pe_add_kernel(%arg0: i32, %arg1: i32, %arg2: memref<2x256xf32, #tpu.memory_space<vmem>>, %arg3: memref<1x256xf32, #tpu.memory_space<vmem>>, %arg4: memref<2x256xf32, #tpu.memory_space<vmem>>) attributes {dimension_semantics = [#tpu.dimension_semantics<parallel>, #tpu.dimension_semantics<parallel>], iteration_bounds = array<i64: 1, 1>, scalar_prefetch = 0 : i64, scratch_operands = 0 : i64, tpu.core_type = #tpu.core_type<tc>, window_params = [{transform_indices = @transform_0, window_bounds = array<i64: 2, 256>}, {transform_indices = @transform_1, window_bounds = array<i64: 1, 256>}, {transform_indices = @transform_2, window_bounds = array<i64: 2, 256>}]} {
    %c0 = arith.constant 0 : index
    %c0_0 = arith.constant 0 : index
    %0 = vector.load %arg2[%c0, %c0_0] : memref<2x256xf32, #tpu.memory_space<vmem>>, vector<2x256xf32>
    %c0_1 = arith.constant 0 : index
    %c0_2 = arith.constant 0 : index
    %1 = vector.load %arg3[%c0_1, %c0_2] : memref<1x256xf32, #tpu.memory_space<vmem>>, vector<1x256xf32>
    %2 = vector.broadcast %1 : vector<1x256xf32> to vector<2x256xf32>
    %3 = arith.addf %0, %2 : vector<2x256xf32>
    %c0_3 = arith.constant 0 : index
    %c0_4 = arith.constant 0 : index
    %4 = vector.load %arg4[%c0_3, %c0_4] : memref<2x256xf32, #tpu.memory_space<vmem>>, vector<2x256xf32>
    tpu.vector_store %arg4[%c0_3, %c0_4], %3 {strides = array<i32>} : memref<2x256xf32, #tpu.memory_space<vmem>>, vector<2x256xf32>,
    return
  }
  func.func @transform_0(%arg0: i32, %arg1: i32) -> (i32, i32) {
    %c0_i32 = arith.constant 0 : i32
    return %arg0, %arg1 : i32, i32
  }
  func.func @transform_1(%arg0: i32, %arg1: i32) -> (i32, i32) {
    %c0_i32 = arith.constant 0 : i32
    %c0_i32_0 = arith.constant 0 : i32
    return %c0_i32, %arg1 : i32, i32
  }
  func.func @transform_2(%arg0: i32, %arg1: i32) -> (i32, i32) {
    %c0_i32 = arith.constant 0 : i32
    return %arg0, %arg1 : i32, i32
  }
}

</mosaic_0001>

<bundles_post_ra>
// kernel: tpu_custom_call.1
= control target key start
LH: loop header
LB: loop body
LE: loop exit
PB: predicated region body
PF: predicated region fallthrough
CT: control target
= control target key end

     0   :  { %7 = vsyncpa [#allocation3], 0  ;;  %s157_s0 = inlined_call_operand.hbm [shape: f32[2,256], index: 0, kind: input, shape index: {}]   ;;  %s158_s1 = inlined_call_operand.vmem [shape: f32[1,256], index: 1, kind: input, shape index: {}]   ;;  %s159_s2 = inlined_call_operand.hbm [shape: f32[2,256], index: 2, kind: output, shape index: {}]  }
   0x1   :  { %8 = vsyncpa [#allocation4], 0  ;;  %s112_s9 = smov [#allocation2]   ;;  %s64_s13 = scalar_lea.hbm %s157_s0, 64 }
   0x2   :  { %s15_s10 = sshll.u32 %s112_s9, 4  ;;  %p65_p0 = scmp.ne.s32.totalorder %s157_s0, %s64_s13  ;;  %s16_s10 = int_to_ptr.vmem [resolvable:$true] %s15_s10 }
   0x3   :  { %p68_p1 = scmp.lt.u32.totalorder %s64_s13, %s157_s0 }
   0x5   :  { %p70_p2 = pnand %p68_p1, %p65_p0 }
   0x7   :  { %73 = shalt.err (!%p70_p2)
}
   0x8   :  { %s74_s18 = scalar_lea.vmem %s16_s10, 64  ;;  %p79_p4 = scmp.lt.s32.totalorder %s16_s10, %s16_s10 }
   0x9   :  { %p75_p3 = scmp.ne.s32.totalorder %s16_s10, %s74_s18  ;;  %p80_p5 = scmp.lt.s32.totalorder %s74_s18, %s74_s18 }
   0xb   :  { %p81_p6 = por %p80_p5, %p79_p4 }
   0xd   :  { %p82_p7 = pnand %p81_p6, %p75_p3 }
   0xf   :  { %85 = shalt.err (!%p82_p7)
}
  0x10   :  { %18 = dma.hbm_to_vmem [thread:$0]  %s157_s0, 64, %s16_s10, [#allocation3]  }
  0x11   :  { %108 = dma.done.wait [#allocation3], 64  }
  0x12   :  { %109 = vsyncadd [#allocation3], 4294967232  ;;  %v27_v0 = vlaneseq  ;;  %v113_v1 = vmov 1983009808   ;;  %v25_v7 = vld [vmem:[%s158_s1] sm:$0x3] }
  0x13   :  { %v37_v2 = vunpack.c.l.s4 %v113_v1  ;;  %v24_v12 = vld [vmem:[#allocation2] sm:$0xf]  ;;  %s114_s23 = smov [#allocation5]  }
  0x14   :  { %v28_v3 = vshrl.u32 %v27_v0, 7  ;;  %s52_s0 = sshll.u32 %s114_s23, 4  ;;  %s53_s0 = int_to_ptr.vmem [resolvable:$true] %s52_s0 }
  0x15   :  { %v38_v6 = vunpack.c.0.s8 %v37_v2  ;;  %s86_s24 = scalar_lea.vmem %s53_s0, 64  ;;  %p91_p9 = scmp.lt.s32.totalorder %s53_s0, %s53_s0 }
  0x16   :  { %v29_v4 = vsub.s32 0, %v28_v3  ;;  %v33_v5 = vsub.s32 1, %v28_v3  ;;  %p87_p8 = scmp.ne.s32.totalorder %s53_s0, %s86_s24  ;;  %p92_p10 = scmp.lt.s32.totalorder %s86_s24, %s86_s24 }
  0x17   :  { %v41_v10 = vsub.s32 %v38_v6, %v28_v3 }
  0x18   :  { %v30_v8 = vrot.slane %v25_v7, %v29_v4  ;;  %v34_v9 = vrot.slane %v25_v7, %v33_v5  ;;  %p93_p11 = por %p92_p10, %p91_p9 }
  0x1a   :  { %v35_v11 = vcombine.low %v30_v8, %v34_v9  ;;  %p94_p12 = pnand %p93_p11, %p87_p8 }
  0x1c   :  { %v42_v13 = vrot.slane %v35_v11, %v41_v10 }
  0x1e   :  { %v44_v14 = vadd.f32 %v42_v13, %v24_v12 }
  0x20   :  { %45 = vst [vmem:[#allocation5] sm:$0xf] %v44_v14 }
  0x21   :  { %97 = shalt.err (!%p94_p12)
}
  0x22   :  { %s98_s26 = scalar_lea.hbm %s159_s2, 64 }
  0x23   :  { %p99_p13 = scmp.ne.s32.totalorder %s159_s2, %s98_s26  ;;  %p102_p0 = scmp.lt.u32.totalorder %s98_s26, %s159_s2 }
  0x25   :  { %p104_p1 = pnand %p102_p0, %p99_p13 }
  0x27   :  { %107 = shalt.err (!%p104_p1)
}
  0x28   :  { %55 = dma.vmem_to_hbm [thread:$0]  %s53_s0, 64, %s159_s2, [#allocation4]  }
  0x29   :  { %110 = dma.done.wait [#allocation4], 64  }
  0x2a   :  { %111 = vsyncadd [#allocation4], 4294967232 }
  0x2b   :  { %59 = vsyncpa [#allocation3], 1 }
  0x2c   :  { %60 = vsyncpa [#allocation4], 1 }

</bundles_post_ra>
